<compile_context>
chip_gen: v5e
topology: v5e:2x2
jax: 0.10.0
libtpu: 0.0.40
codegen_flags: <defaults>
</compile_context>

<pallas_src>
import functools

import jax
import jax.numpy as jnp
from jax.experimental import pallas as pl
from jax.experimental.pallas import tpu as pltpu


def _loss_kernel(pred_ref, a1_ref, a2_ref, v1_ref, v2_ref, label_ref,
                 bce_part_ref, l2_part_ref, *, batch, need_mask):
    f32 = jnp.float32
    pred = pred_ref[...].astype(f32)     # (TB, 1)
    lab = label_ref[...].astype(f32)     # (TB, 1)
    a1 = a1_ref[...].astype(f32)         # (TB, D)
    a2 = a2_ref[...].astype(f32)
    v1 = v1_ref[...].astype(f32)
    v2 = v2_ref[...].astype(f32)

    # ---- BCE per sample (PyTorch clamps log() at -100) ----
    log_p = jnp.maximum(jnp.log(pred), -100.0)
    log_1mp = jnp.maximum(jnp.log(1.0 - pred), -100.0)
    bce = -(lab * log_p + (1.0 - lab) * log_1mp)           # (TB, 1)

    # ---- cosine similarities: 8 unique D-axis reductions (deduped norms) ----
    ss_a1 = jnp.sum(a1 * a1, axis=1, keepdims=True)        # (TB, 1)
    ss_a2 = jnp.sum(a2 * a2, axis=1, keepdims=True)
    ss_v1 = jnp.sum(v1 * v1, axis=1, keepdims=True)
    ss_v2 = jnp.sum(v2 * v2, axis=1, keepdims=True)
    d_aa = jnp.sum(a1 * a2, axis=1, keepdims=True)
    d_vv = jnp.sum(v1 * v2, axis=1, keepdims=True)
    d_av1 = jnp.sum(a1 * v1, axis=1, keepdims=True)
    d_av2 = jnp.sum(a2 * v2, axis=1, keepdims=True)

    # torch.nn.CosineSimilarity: x.y / max(||x||*||y||, eps)  ->  rsqrt on product
    eps2 = f32(1e-8 * 1e-8)
    cos_aa = d_aa * jax.lax.rsqrt(jnp.maximum(ss_a1 * ss_a2, eps2))
    cos_vv = d_vv * jax.lax.rsqrt(jnp.maximum(ss_v1 * ss_v2, eps2))
    cos_1 = d_av1 * jax.lax.rsqrt(jnp.maximum(ss_a1 * ss_v1, eps2))
    cos_2 = d_av2 * jax.lax.rsqrt(jnp.maximum(ss_a2 * ss_v2, eps2))

    loss_pos = lab * (2.0 - cos_aa - cos_vv)
    loss_sim = 2.0 - cos_1 - cos_2
    loss_neg = (1.0 - lab) * (jnp.maximum(cos_aa - 0.2, 0.0)
                              + jnp.maximum(cos_vv - 0.2, 0.0))
    loss_2 = loss_neg + loss_pos + loss_sim                 # (TB, 1)

    if need_mask:
        tb = pred.shape[0]
        rows = (jax.lax.broadcasted_iota(jnp.int32, (tb, 1), 0)
                + pl.program_id(0) * tb)
        valid = rows < batch
        bce = jnp.where(valid, bce, 0.0)
        loss_2 = jnp.where(valid, loss_2, 0.0)

    # Per-block partial sums, broadcast into one (8,128) tile each (lane-dense store).
    bce_part_ref[...] = jnp.broadcast_to(jnp.sum(bce), bce_part_ref.shape)
    l2_part_ref[...] = jnp.broadcast_to(jnp.sum(loss_2), l2_part_ref.shape)


def multi_loss(pred, audio1_enc, audio2_enc, video1_enc, video2_enc, label,
               reg=0.03, block_b=None):
    """JAX/Pallas equivalent of Loss.forward. Returns (scalar_loss, pred_flat)."""
    B, D = audio1_enc.shape
    pred2d = pred.reshape(-1, 1)               # keep native dtype (bf16 friendly)
    label2d = label.reshape(-1, 1)
    if not jnp.issubdtype(label2d.dtype, jnp.floating):
        label2d = label2d.astype(jnp.float32)

    enc_itemsize = jnp.dtype(audio1_enc.dtype).itemsize

    # Batch-tile size: ~1.5 MiB per encoding buffer -> 4 enc x 2 bufs ~= 12 MiB VMEM,
    # safe under the default scoped limits on v5e/v6e/v7x.
    if block_b is None:
        budget_bytes = (3 * 1024 * 1024) // 2
        tb = budget_bytes // max(D * enc_itemsize, 1)
        tb = max(8, min(int(tb), 2048))
    else:
        tb = int(block_b)

    if tb >= B:
        tb = B                      # single block covers the whole batch (any B)
        need_mask = False
    else:
        tb = max(8, (tb // 8) * 8)  # sublane-aligned tile
        need_mask = (B % tb) != 0
    nb = pl.cdiv(B, tb)

    kernel = functools.partial(_loss_kernel, batch=B, need_mask=need_mask)

    flops = 16 * B * D + 32 * B
    transcendentals = 6 * B
    bytes_accessed = (4 * B * D * enc_itemsize
                      + B * (jnp.dtype(pred2d.dtype).itemsize
                             + jnp.dtype(label2d.dtype).itemsize)
                      + 2 * nb * 8 * 128 * 4)

    bce_parts, l2_parts = pl.pallas_call(
        kernel,
        out_shape=(
            jax.ShapeDtypeStruct((nb, 8, 128), jnp.float32),
            jax.ShapeDtypeStruct((nb, 8, 128), jnp.float32),
        ),
        grid=(nb,),
        in_specs=[
            pl.BlockSpec((tb, 1), lambda i: (i, 0)),   # pred
            pl.BlockSpec((tb, D), lambda i: (i, 0)),   # audio1_enc
            pl.BlockSpec((tb, D), lambda i: (i, 0)),   # audio2_enc
            pl.BlockSpec((tb, D), lambda i: (i, 0)),   # video1_enc
            pl.BlockSpec((tb, D), lambda i: (i, 0)),   # video2_enc
            pl.BlockSpec((tb, 1), lambda i: (i, 0)),   # label
        ],
        out_specs=(
            pl.BlockSpec((1, 8, 128), lambda i: (i, 0, 0)),
            pl.BlockSpec((1, 8, 128), lambda i: (i, 0, 0)),
        ),
        compiler_params=pltpu.CompilerParams(
            dimension_semantics=("parallel",),
            vmem_limit_bytes=32 * 1024 * 1024),
        cost_estimate=pl.CostEstimate(
            flops=flops, transcendentals=transcendentals,
            bytes_accessed=bytes_accessed),
    )(pred2d, audio1_enc, audio2_enc, video1_enc, video2_enc, label2d)

    # Tiny final reduction + combine in plain JAX:
    #   loss = mean(bce) + reg * mean(loss_2) = (sum(bce) + reg*sum(loss_2)) / B
    bce_total = jnp.sum(bce_parts[:, 0, 0])
    l2_total = jnp.sum(l2_parts[:, 0, 0])
    loss = (bce_total + jnp.float32(reg) * l2_total) / jnp.float32(B)
    return loss, pred.reshape(-1)


def _reference_loss(pred, a1, a2, v1, v2, label, reg=0.03):
    """Pure-JAX reference of the same math (for the sanity check)."""
    def _cos(x, y, eps=1e-8):
        num = jnp.sum(x * y, axis=1)
        nx = jnp.maximum(jnp.linalg.norm(x, axis=1), eps)
        ny = jnp.maximum(jnp.linalg.norm(y, axis=1), eps)
        return num / (nx * ny)

    lab = label.reshape(-1)
    p = pred.reshape(-1)
    bce = -(lab * jnp.maximum(jnp.log(p), -100.0)
            + (1 - lab) * jnp.maximum(jnp.log(1 - p), -100.0)).mean()
    caa, cvv = _cos(a1, a2), _cos(v1, v2)
    c1, c2 = _cos(a1, v1), _cos(a2, v2)
    l2 = ((1 - lab) * (jnp.maximum(caa - 0.2, 0) + jnp.maximum(cvv - 0.2, 0))
          + lab * (1 - caa + 1 - cvv) + (1 - c1) + (1 - c2))
    return (bce + reg * l2).mean()


if __name__ == "__main__":
    key = jax.random.PRNGKey(0)

    # ---- test 1: small shapes, single block ----
    B, D = 8, 32
    k_pred, k_a1, k_a2, k_v1, k_v2, k_lab = jax.random.split(key, 6)
    pred = jax.nn.sigmoid(jax.random.normal(k_pred, (B, 1), dtype=jnp.float32))
    audio1 = jax.random.normal(k_a1, (B, D), dtype=jnp.float32)
    audio2 = jax.random.normal(k_a2, (B, D), dtype=jnp.float32)
    video1 = jax.random.normal(k_v1, (B, D), dtype=jnp.float32)
    video2 = jax.random.normal(k_v2, (B, D), dtype=jnp.float32)
    label = jax.random.bernoulli(k_lab, 0.5, (B,)).astype(jnp.float32)

    loss, pred_flat = multi_loss(pred, audio1, audio2, video1, video2, label)
    jax.block_until_ready((loss, pred_flat))
    ref = _reference_loss(pred, audio1, audio2, video1, video2, label)
    assert jnp.allclose(loss, ref, rtol=1e-5, atol=1e-5), (loss, ref)
    assert jnp.allclose(pred_flat, pred.reshape(-1))

    # ---- test 2: multi-block grid with a partial (masked) tail block ----
    B2, D2 = 20, 64
    k2 = jax.random.split(jax.random.PRNGKey(1), 6)
    pred2 = jax.nn.sigmoid(jax.random.normal(k2[0], (B2, 1), dtype=jnp.float32))
    a1b = jax.random.normal(k2[1], (B2, D2), dtype=jnp.float32)
    a2b = jax.random.normal(k2[2], (B2, D2), dtype=jnp.float32)
    v1b = jax.random.normal(k2[3], (B2, D2), dtype=jnp.float32)
    v2b = jax.random.normal(k2[4], (B2, D2), dtype=jnp.float32)
    lab2 = jax.random.bernoulli(k2[5], 0.5, (B2,)).astype(jnp.float32)

    loss2, _ = multi_loss(pred2, a1b, a2b, v1b, v2b, lab2, block_b=8)
    jax.block_until_ready(loss2)
    ref2 = _reference_loss(pred2, a1b, a2b, v1b, v2b, lab2)
    assert jnp.allclose(loss2, ref2, rtol=1e-5, atol=1e-5), (loss2, ref2)

    print("KERNEL_OK")
</pallas_src>

<mosaic_0001>
module attributes {stable_mosaic.version = 11 : i64} {
  func.func @_loss_kernel(%arg0: i32, %arg1: memref<8x1xf32, #tpu.memory_space<vmem>>, %arg2: memref<8x32xf32, #tpu.memory_space<vmem>>, %arg3: memref<8x32xf32, #tpu.memory_space<vmem>>, %arg4: memref<8x32xf32, #tpu.memory_space<vmem>>, %arg5: memref<8x32xf32, #tpu.memory_space<vmem>>, %arg6: memref<8x1xf32, #tpu.memory_space<vmem>>, %arg7: memref<1x8x128xf32, #tpu.memory_space<vmem>>, %arg8: memref<1x8x128xf32, #tpu.memory_space<vmem>>) attributes {dimension_semantics = [#tpu.dimension_semantics<parallel>], iteration_bounds = array<i64: 1>, scalar_prefetch = 0 : i64, scratch_operands = 0 : i64, tpu.core_type = #tpu.core_type<tc>, window_params = [{transform_indices = @transform_0, window_bounds = array<i64: 8, 1>}, {transform_indices = @transform_1, window_bounds = array<i64: 8, 32>}, {transform_indices = @transform_2, window_bounds = array<i64: 8, 32>}, {transform_indices = @transform_3, window_bounds = array<i64: 8, 32>}, {transform_indices = @transform_4, window_bounds = array<i64: 8, 32>}, {transform_indices = @transform_5, window_bounds = array<i64: 8, 1>}, {transform_indices = @transform_6, window_bounds = array<i64: 1, 8, 128>}, {transform_indices = @transform_7, window_bounds = array<i64: 1, 8, 128>}]} {
    %c0 = arith.constant 0 : index
    %c0_0 = arith.constant 0 : index
    %0 = vector.load %arg1[%c0, %c0_0] : memref<8x1xf32, #tpu.memory_space<vmem>>, vector<8x1xf32>
    %c0_1 = arith.constant 0 : index
    %c0_2 = arith.constant 0 : index
    %1 = vector.load %arg6[%c0_1, %c0_2] : memref<8x1xf32, #tpu.memory_space<vmem>>, vector<8x1xf32>
    %c0_3 = arith.constant 0 : index
    %c0_4 = arith.constant 0 : index
    %2 = vector.load %arg2[%c0_3, %c0_4] : memref<8x32xf32, #tpu.memory_space<vmem>>, vector<8x32xf32>
    %c0_5 = arith.constant 0 : index
    %c0_6 = arith.constant 0 : index
    %3 = vector.load %arg3[%c0_5, %c0_6] : memref<8x32xf32, #tpu.memory_space<vmem>>, vector<8x32xf32>
    %c0_7 = arith.constant 0 : index
    %c0_8 = arith.constant 0 : index
    %4 = vector.load %arg4[%c0_7, %c0_8] : memref<8x32xf32, #tpu.memory_space<vmem>>, vector<8x32xf32>
    %c0_9 = arith.constant 0 : index
    %c0_10 = arith.constant 0 : index
    %5 = vector.load %arg5[%c0_9, %c0_10] : memref<8x32xf32, #tpu.memory_space<vmem>>, vector<8x32xf32>
    %6 = math.log %0 : vector<8x1xf32>
    %cst = arith.constant -1.000000e+02 : f32
    %7 = vector.broadcast %cst : f32 to vector<8x1xf32>
    %8 = arith.maximumf %6, %7 : vector<8x1xf32>
    %cst_11 = arith.constant 1.000000e+00 : f32
    %9 = vector.broadcast %cst_11 : f32 to vector<8x1xf32>
    %10 = arith.subf %9, %0 : vector<8x1xf32>
    %11 = math.log %10 : vector<8x1xf32>
    %cst_12 = arith.constant -1.000000e+02 : f32
    %12 = vector.broadcast %cst_12 : f32 to vector<8x1xf32>
    %13 = arith.maximumf %11, %12 : vector<8x1xf32>
    %14 = arith.mulf %1, %8 : vector<8x1xf32>
    %cst_13 = arith.constant 1.000000e+00 : f32
    %15 = vector.broadcast %cst_13 : f32 to vector<8x1xf32>
    %16 = arith.subf %15, %1 : vector<8x1xf32>
    %17 = arith.mulf %16, %13 : vector<8x1xf32>
    %18 = arith.addf %14, %17 : vector<8x1xf32>
    %cst_14 = arith.constant 0.000000e+00 : f32
    %19 = vector.broadcast %cst_14 : f32 to vector<8x1xf32>
    %20 = arith.subf %19, %18 : vector<8x1xf32>
    %21 = arith.mulf %2, %2 : vector<8x32xf32>
    %cst_15 = arith.constant dense<0.000000e+00> : vector<8xf32>
    %22 = vector.multi_reduction <add>, %21, %cst_15 [1] : vector<8x32xf32> to vector<8xf32>
    %23 = vector.shape_cast %22 : vector<8xf32> to vector<8x1xf32>
    %24 = arith.mulf %3, %3 : vector<8x32xf32>
    %cst_16 = arith.constant dense<0.000000e+00> : vector<8xf32>
    %25 = vector.multi_reduction <add>, %24, %cst_16 [1] : vector<8x32xf32> to vector<8xf32>
    %26 = vector.shape_cast %25 : vector<8xf32> to vector<8x1xf32>
    %27 = arith.mulf %4, %4 : vector<8x32xf32>
    %cst_17 = arith.constant dense<0.000000e+00> : vector<8xf32>
    %28 = vector.multi_reduction <add>, %27, %cst_17 [1] : vector<8x32xf32> to vector<8xf32>
    %29 = vector.shape_cast %28 : vector<8xf32> to vector<8x1xf32>
    %30 = arith.mulf %5, %5 : vector<8x32xf32>
    %cst_18 = arith.constant dense<0.000000e+00> : vector<8xf32>
    %31 = vector.multi_reduction <add>, %30, %cst_18 [1] : vector<8x32xf32> to vector<8xf32>
    %32 = vector.shape_cast %31 : vector<8xf32> to vector<8x1xf32>
    %33 = arith.mulf %2, %3 : vector<8x32xf32>
    %cst_19 = arith.constant dense<0.000000e+00> : vector<8xf32>
    %34 = vector.multi_reduction <add>, %33, %cst_19 [1] : vector<8x32xf32> to vector<8xf32>
    %35 = vector.shape_cast %34 : vector<8xf32> to vector<8x1xf32>
    %36 = arith.mulf %4, %5 : vector<8x32xf32>
    %cst_20 = arith.constant dense<0.000000e+00> : vector<8xf32>
    %37 = vector.multi_reduction <add>, %36, %cst_20 [1] : vector<8x32xf32> to vector<8xf32>
    %38 = vector.shape_cast %37 : vector<8xf32> to vector<8x1xf32>
    %39 = arith.mulf %2, %4 : vector<8x32xf32>
    %cst_21 = arith.constant dense<0.000000e+00> : vector<8xf32>
    %40 = vector.multi_reduction <add>, %39, %cst_21 [1] : vector<8x32xf32> to vector<8xf32>
    %41 = vector.shape_cast %40 : vector<8xf32> to vector<8x1xf32>
    %42 = arith.mulf %3, %5 : vector<8x32xf32>
    %cst_22 = arith.constant dense<0.000000e+00> : vector<8xf32>
    %43 = vector.multi_reduction <add>, %42, %cst_22 [1] : vector<8x32xf32> to vector<8xf32>
    %44 = vector.shape_cast %43 : vector<8xf32> to vector<8x1xf32>
    %45 = arith.mulf %23, %26 : vector<8x1xf32>
    %cst_23 = arith.constant 1.000000e-16 : f32
    %46 = vector.broadcast %cst_23 : f32 to vector<8x1xf32>
    %47 = arith.maximumf %45, %46 : vector<8x1xf32>
    %48 = math.rsqrt %47 : vector<8x1xf32>
    %49 = arith.mulf %35, %48 : vector<8x1xf32>
    %50 = arith.mulf %29, %32 : vector<8x1xf32>
    %cst_24 = arith.constant 1.000000e-16 : f32
    %51 = vector.broadcast %cst_24 : f32 to vector<8x1xf32>
    %52 = arith.maximumf %50, %51 : vector<8x1xf32>
    %53 = math.rsqrt %52 : vector<8x1xf32>
    %54 = arith.mulf %38, %53 : vector<8x1xf32>
    %55 = arith.mulf %23, %29 : vector<8x1xf32>
    %cst_25 = arith.constant 1.000000e-16 : f32
    %56 = vector.broadcast %cst_25 : f32 to vector<8x1xf32>
    %57 = arith.maximumf %55, %56 : vector<8x1xf32>
    %58 = math.rsqrt %57 : vector<8x1xf32>
    %59 = arith.mulf %41, %58 : vector<8x1xf32>
    %60 = arith.mulf %26, %32 : vector<8x1xf32>
    %cst_26 = arith.constant 1.000000e-16 : f32
    %61 = vector.broadcast %cst_26 : f32 to vector<8x1xf32>
    %62 = arith.maximumf %60, %61 : vector<8x1xf32>
    %63 = math.rsqrt %62 : vector<8x1xf32>
    %64 = arith.mulf %44, %63 : vector<8x1xf32>
    %cst_27 = arith.constant 2.000000e+00 : f32
    %65 = vector.broadcast %cst_27 : f32 to vector<8x1xf32>
    %66 = arith.subf %65, %49 : vector<8x1xf32>
    %67 = arith.subf %66, %54 : vector<8x1xf32>
    %68 = arith.mulf %1, %67 : vector<8x1xf32>
    %cst_28 = arith.constant 2.000000e+00 : f32
    %69 = vector.broadcast %cst_28 : f32 to vector<8x1xf32>
    %70 = arith.subf %69, %59 : vector<8x1xf32>
    %71 = arith.subf %70, %64 : vector<8x1xf32>
    %cst_29 = arith.constant 1.000000e+00 : f32
    %72 = vector.broadcast %cst_29 : f32 to vector<8x1xf32>
    %73 = arith.subf %72, %1 : vector<8x1xf32>
    %cst_30 = arith.constant 2.000000e-01 : f32
    %74 = vector.broadcast %cst_30 : f32 to vector<8x1xf32>
    %75 = arith.subf %49, %74 : vector<8x1xf32>
    %cst_31 = arith.constant 0.000000e+00 : f32
    %76 = vector.broadcast %cst_31 : f32 to vector<8x1xf32>
    %77 = arith.maximumf %75, %76 : vector<8x1xf32>
    %cst_32 = arith.constant 2.000000e-01 : f32
    %78 = vector.broadcast %cst_32 : f32 to vector<8x1xf32>
    %79 = arith.subf %54, %78 : vector<8x1xf32>
    %cst_33 = arith.constant 0.000000e+00 : f32
    %80 = vector.broadcast %cst_33 : f32 to vector<8x1xf32>
    %81 = arith.maximumf %79, %80 : vector<8x1xf32>
    %82 = arith.addf %77, %81 : vector<8x1xf32>
    %83 = arith.mulf %73, %82 : vector<8x1xf32>
    %84 = arith.addf %83, %68 : vector<8x1xf32>
    %85 = arith.addf %84, %71 : vector<8x1xf32>
    %86 = vector.shape_cast %20 : vector<8x1xf32> to vector<1x8x1xf32>
    %cst_34 = arith.constant dense<0.000000e+00> : vector<1xf32>
    %87 = vector.multi_reduction <add>, %86, %cst_34 [1, 2] : vector<1x8x1xf32> to vector<1xf32>
    %88 = vector.shape_cast %87 : vector<1xf32> to vector<1x1x1xf32>
    %89 = vector.extract %88[0, 0, 0] : f32 from vector<1x1x1xf32>
    %90 = vector.broadcast %89 : f32 to vector<1x8x128xf32>
    %c0_35 = arith.constant 0 : index
    %c0_36 = arith.constant 0 : index
    %c0_37 = arith.constant 0 : index
    %91 = vector.load %arg7[%c0_35, %c0_36, %c0_37] : memref<1x8x128xf32, #tpu.memory_space<vmem>>, vector<1x8x128xf32>
    tpu.vector_store %arg7[%c0_35, %c0_36, %c0_37], %90 {strides = array<i32>} : memref<1x8x128xf32, #tpu.memory_space<vmem>>, vector<1x8x128xf32>,
    %92 = vector.shape_cast %85 : vector<8x1xf32> to vector<1x8x1xf32>
    %cst_38 = arith.constant dense<0.000000e+00> : vector<1xf32>
    %93 = vector.multi_reduction <add>, %92, %cst_38 [1, 2] : vector<1x8x1xf32> to vector<1xf32>
    %94 = vector.shape_cast %93 : vector<1xf32> to vector<1x1x1xf32>
    %95 = vector.extract %94[0, 0, 0] : f32 from vector<1x1x1xf32>
    %96 = vector.broadcast %95 : f32 to vector<1x8x128xf32>
    %c0_39 = arith.constant 0 : index
    %c0_40 = arith.constant 0 : index
    %c0_41 = arith.constant 0 : index
    %97 = vector.load %arg8[%c0_39, %c0_40, %c0_41] : memref<1x8x128xf32, #tpu.memory_space<vmem>>, vector<1x8x128xf32>
    tpu.vector_store %arg8[%c0_39, %c0_40, %c0_41], %96 {strides = array<i32>} : memref<1x8x128xf32, #tpu.memory_space<vmem>>, vector<1x8x128xf32>,
    return
  }
  func.func @transform_0(%arg0: i32) -> (i32, i32) {
    %c0_i32 = arith.constant 0 : i32
    %c0_i32_0 = arith.constant 0 : i32
    return %arg0, %c0_i32 : i32, i32
  }
  func.func @transform_1(%arg0: i32) -> (i32, i32) {
    %c0_i32 = arith.constant 0 : i32
    %c0_i32_0 = arith.constant 0 : i32
    return %arg0, %c0_i32 : i32, i32
  }
  func.func @transform_2(%arg0: i32) -> (i32, i32) {
    %c0_i32 = arith.constant 0 : i32
    %c0_i32_0 = arith.constant 0 : i32
    return %arg0, %c0_i32 : i32, i32
  }
  func.func @transform_3(%arg0: i32) -> (i32, i32) {
    %c0_i32 = arith.constant 0 : i32
    %c0_i32_0 = arith.constant 0 : i32
    return %arg0, %c0_i32 : i32, i32
  }
  func.func @transform_4(%arg0: i32) -> (i32, i32) {
    %c0_i32 = arith.constant 0 : i32
    %c0_i32_0 = arith.constant 0 : i32
    return %arg0, %c0_i32 : i32, i32
  }
  func.func @transform_5(%arg0: i32) -> (i32, i32) {
    %c0_i32 = arith.constant 0 : i32
    %c0_i32_0 = arith.constant 0 : i32
    return %arg0, %c0_i32 : i32, i32
  }
  func.func @transform_6(%arg0: i32) -> (i32, i32, i32) {
    %c0_i32 = arith.constant 0 : i32
    %c0_i32_0 = arith.constant 0 : i32
    %c0_i32_1 = arith.constant 0 : i32
    return %arg0, %c0_i32, %c0_i32_0 : i32, i32, i32
  }
  func.func @transform_7(%arg0: i32) -> (i32, i32, i32) {
    %c0_i32 = arith.constant 0 : i32
    %c0_i32_0 = arith.constant 0 : i32
    %c0_i32_1 = arith.constant 0 : i32
    return %arg0, %c0_i32, %c0_i32_0 : i32, i32, i32
  }
}

</mosaic_0001>

<bundles_post_ra>
// kernel: tpu_custom_call.1
= control target key start
LH: loop header
LB: loop body
LE: loop exit
PB: predicated region body
PF: predicated region fallthrough
CT: control target
= control target key end

     0   :  { %13 = vsyncpa [#allocation3], 0  ;;  %s443_s0 = inlined_call_operand.vmem [shape: f32[8,1], index: 0, kind: input, shape index: {}]   ;;  %s444_s1 = inlined_call_operand.vmem [shape: f32[8,32], index: 1, kind: input, shape index: {}]   ;;  %s445_s2 = inlined_call_operand.vmem [shape: f32[8,32], index: 2, kind: input, shape index: {}]   ;;  %s446_s3 = inlined_call_operand.hbm [shape: f32[8,32], index: 3, kind: input, shape index: {}]   ;;  %s447_s4 = inlined_call_operand.hbm [shape: f32[8,32], index: 4, kind: input, shape index: {}]   ;;  %s448_s5 = inlined_call_operand.vmem [shape: f32[8,1], index: 5, kind: input, shape index: {}]   ;;  %s449_s6 = inlined_call_operand.hbm [shape: f32[1,8,128], index: 6, kind: output, shape index: {0}]   ;;  %s450_s7 = inlined_call_operand.hbm [shape: f32[1,8,128], index: 7, kind: output, shape index: {1}]  }
   0x1   :  { %14 = vsyncpa [#allocation6], 0 }
   0x2   :  { %15 = vsyncpa [#allocation4], 0 }
   0x3   :  { %16 = vsyncpa [#allocation9], 0  ;;  %s28_s26 = sshll.u32 %s446_s3, 4  ;;  %s356_s27 = smov [#allocation2]   ;;  %s29_s26 = int_to_ptr.hbm [resolvable:$true] %s28_s26 }
   0x4   :  { %s30_s28 = sshll.u32 %s356_s27, 4  ;;  %s39_s8 = sshll.u32 %s447_s4, 4  ;;  %s31_s28 = int_to_ptr.vmem [resolvable:$true] %s30_s28  ;;  %s40_s8 = int_to_ptr.hbm [resolvable:$true] %s39_s8 }
   0x5   :  { %33 = dma.hbm_to_vmem [thread:$0]  %s29_s26, 128, %s31_s28, [#allocation3]  }
   0x6   :  { %s357_s9 = smov [#allocation5]  }
   0x7   :  { %s41_s10 = sshll.u32 %s357_s9, 4  ;;  %s42_s10 = int_to_ptr.vmem [resolvable:$true] %s41_s10 }
   0x8   :  { %44 = dma.hbm_to_vmem [thread:$0]  %s40_s8, 128, %s42_s10, [#allocation6]  }
   0x9   :  { %348 = dma.done.wait [#allocation3], 128  }
   0xa   :  { %349 = vsyncadd [#allocation3], 4294967168 }
   0xb   :  { %350 = dma.done.wait [#allocation6], 128  }
   0xc   :  { %351 = vsyncadd [#allocation6], 4294967168  ;;  %v59_v0 = vld [vmem:[#allocation2] sm:$0xff]  ;;  %vm74_vm0 = vcmask 261120   ;;  %v60_v5 = vld [vmem:[#allocation5] sm:$0xff]  ;;  %vm171_vm1 = vcmask 7168  }
   0xd   :  { %v57_v1 = vld [vmem:[%s444_s1] sm:$0xff]  ;;  %v82_v2 = vmul.f32 %v59_v0, %v59_v0  ;;  %v86_v10 = vmul.f32 %v60_v5, %v60_v5  ;;  %v94_v12 = vmul.f32 %v60_v5, %v59_v0  ;;  %s203_s17 = sshll.u32 %s449_s6, 4  ;;  %s359_s19 = smov [#allocation8]   ;;  %s204_s17 = int_to_ptr.hbm [resolvable:$true] %s203_s17 }
   0xe   :  { %v73_v3 = vmul.f32 %v57_v1, %v57_v1  ;;  %v58_v4 = vld [vmem:[%s445_s2] sm:$0xff]  ;;  %v98_v16 = vmul.f32 %v59_v0, %v57_v1  ;;  %s212_s20 = sshll.u32 %s359_s19, 4  ;;  %s214_s23 = sshll.u32 %s450_s7, 4  ;;  %s213_s20 = int_to_ptr.vmem [resolvable:$true] %s212_s20  ;;  %s215_s23 = int_to_ptr.hbm [resolvable:$true] %s214_s23 }
   0xf   :  { %v90_v6 = vmul.f32 %v58_v4, %v57_v1  ;;  %v83_v7 = vsel %vm74_vm0, %v82_v2, 0.0  ;;  %v78_v11 = vmul.f32 %v58_v4, %v58_v4  ;;  %v87_v13 = vsel %vm74_vm0, %v86_v10, 0.0  ;;  %v55_v20 = vld [vmem:[%s443_s0] sm:$0xff]  ;;  %s358_s0 = smov [#allocation7]  }
  0x10   :  { %v75_v8 = vsel %vm74_vm0, %v73_v3, 0.0  ;;  %84 = vadd.xlane.f32.xlu1 %v83_v7  ;;  %v95_v15 = vsel %vm74_vm0, %v94_v12, 0.0  ;;  %v102_v17 = vmul.f32 %v60_v5, %v58_v4  ;;  %v99_v18 = vsel %vm74_vm0, %v98_v16, 0.0  ;;  %v426_v27 = vld [vmem:[%s448_s5] sm:$0xff]  ;;  %s201_s5 = sshll.u32 %s358_s0, 4  ;;  %s202_s5 = int_to_ptr.vmem [resolvable:$true] %s201_s5 }
  0x11   :  { %76 = vadd.xlane.f32.xlu0 %v75_v8  ;;  %v91_v9 = vsel %vm74_vm0, %v90_v6, 0.0  ;;  %v79_v14 = vsel %vm74_vm0, %v78_v11, 0.0  ;;  %v64_v21 = vsub.f32 1.0, %v55_v20  ;;  %240 = vlog2.f32 %v55_v20 }
  0x12   :  { %92 = vadd.xlane.f32.xlu2 %v91_v9  ;;  %v103_v19 = vsel %vm74_vm0, %v102_v17, 0.0  ;;  %v69_v31 = vsub.f32 1.0, %v426_v27 }
  0x13   :  { %242 = vlog2.f32 %v64_v21 }
  0x17   :  { %v241_v22 = vpop.eup %240 }
  0x18   :  { %88 = vadd.xlane.f32.xlu1 %v87_v13  ;;  %v62_v24 = vmul.f32 0.6931472, %v241_v22 }
  0x19   :  { %80 = vadd.xlane.f32.xlu0 %v79_v14  ;;  %v243_v23 = vpop.eup %242 }
  0x1a   :  { %96 = vadd.xlane.f32.xlu2 %v95_v15  ;;  %v66_v28 = vmul.f32 0.6931472, %v243_v23  ;;  %v63_v30 = vmax.f32 %v62_v24, -100.0 }
  0x1c   :  { %v67_v32 = vmax.f32 %v66_v28, -100.0  ;;  %v68_v34 = vmul.f32 %v63_v30, %v426_v27 }
  0x1e   :  { %v70_v35 = vmul.f32 %v69_v31, %v67_v32 }
  0x20   :  { %104 = vadd.xlane.f32.xlu1 %v103_v19  ;;  %v71_v36 = vadd.f32 %v70_v35, %v68_v34 }
  0x21   :  { %100 = vadd.xlane.f32.xlu0 %v99_v18 }
  0x22   :  { %v72_v39 = vsub.f32 0.0, %v71_v36 }
  0x24   :  { %v172_v43 = vsel %vm171_vm1, %v72_v39, 0.0 }
  0x25   :  { %173 = vadd.xlane.f32.xlu2 %v172_v43 }
  0x83   :  { %v85_v25 = vpop.xlane.xlu1 %84 }
  0x84   :  { %v77_v26 = vpop.xlane.xlu0 %76 }
  0x85   :  { %v132_v29 = vmul.f32 %v85_v25, %v77_v26  ;;  %v93_v50 = vpop.xlane.xlu2 %92 }
  0x87   :  { %v133_v33 = vmax.f32 %v132_v29, 1e-16 }
  0x89   :  { %244 = vrsqrt.f32 %v133_v33  ;;  %vm140_vm9 = vweird.f32 %v133_v33 }
  0x8b   :  { %v89_v37 = vpop.xlane.xlu1 %88 }
  0x8c   :  { %v81_v38 = vpop.xlane.xlu0 %80  ;;  %v119_v40 = vmul.f32 %v89_v37, %v85_v25 }
  0x8d   :  { %v106_v41 = vmul.f32 %v81_v38, %v77_v26  ;;  %v145_v42 = vmul.f32 %v89_v37, %v81_v38  ;;  %v97_v5 = vpop.xlane.xlu2 %96 }
  0x8e   :  { %v120_v45 = vmax.f32 %v119_v40, 1e-16 }
  0x8f   :  { %v245_v44 = vpop.eup %244  ;;  %v107_v46 = vmax.f32 %v106_v41, 1e-16  ;;  %v146_v47 = vmax.f32 %v145_v42, 1e-16 }
  0x90   :  { %v135_v48 = vmul.f32 %v245_v44, %v133_v33  ;;  %246 = vrsqrt.f32 %v120_v45  ;;  %vm127_vm4 = vweird.f32 %v120_v45  ;;  %vm141_vm6 = vweird.f32 %v245_v44 }
  0x91   :  { %248 = vrsqrt.f32 %v107_v46  ;;  %vm114_vm5 = vweird.f32 %v107_v46  ;;  %vm142_vm11 = vmor %vm140_vm9, %vm141_vm6  ;;  %vm153_vm12 = vweird.f32 %v146_v47 }
  0x92   :  { %250 = vrsqrt.f32 %v146_v47  ;;  %v136_v49 = vmul.f32 %v245_v44, %v135_v48 }
  0x93   :  { %v105_v18 = vpop.xlane.xlu1 %104 }
  0x94   :  { %v137_v56 = vmul.f32 0.5, %v136_v49  ;;  %v101_v14 = vpop.xlane.xlu0 %100 }
  0x96   :  { %v247_v51 = vpop.eup %246  ;;  %v138_v63 = vsub.f32 1.5, %v137_v56 }
  0x97   :  { %v249_v52 = vpop.eup %248  ;;  %v122_v53 = vmul.f32 %v247_v51, %v120_v45  ;;  %vm128_vm2 = vweird.f32 %v247_v51 }
  0x98   :  { %v251_v54 = vpop.eup %250  ;;  %v109_v55 = vmul.f32 %v249_v52, %v107_v46  ;;  %vm115_vm3 = vweird.f32 %v249_v52  ;;  %v139_v7 = vmul.f32 %v245_v44, %v138_v63  ;;  %vm129_vm7 = vmor %vm127_vm4, %vm128_vm2  ;;  %v174_v35 = vpop.xlane.xlu2 %173 }
  0x99   :  { %v123_v57 = vmul.f32 %v247_v51, %v122_v53  ;;  %v148_v58 = vmul.f32 %v251_v54, %v146_v47  ;;  %vm116_vm8 = vmor %vm114_vm5, %vm115_vm3  ;;  %vm154_vm10 = vweird.f32 %v251_v54  ;;  %v175_v36 = vrot.slane %v174_v35, 4 }
  0x9a   :  { %v110_v59 = vmul.f32 %v249_v52, %v109_v55  ;;  %v143_v13 = vsel %vm142_vm11, %v245_v44, %v139_v7  ;;  %vm155_vm13 = vmor %vm153_vm12, %vm154_vm10 }
  0x9b   :  { %v149_v60 = vmul.f32 %v251_v54, %v148_v58  ;;  %v124_v61 = vmul.f32 0.5, %v123_v57  ;;  %v144_v22 = vmul.f32 %v143_v13, %v101_v14  ;;  %v176_v37 = vadd.f32 %v175_v36, %v174_v35 }
  0x9c   :  { %v111_v62 = vmul.f32 0.5, %v110_v59 }
  0x9d   :  { %v150_v0 = vmul.f32 0.5, %v149_v60  ;;  %v125_v1 = vsub.f32 1.5, %v124_v61  ;;  %v161_v26 = vsub.f32 2.0, %v144_v22  ;;  %v177_v38 = vrot.slane %v176_v37, 2 }
  0x9e   :  { %v112_v2 = vsub.f32 1.5, %v111_v62 }
  0x9f   :  { %v151_v3 = vsub.f32 1.5, %v150_v0  ;;  %v126_v4 = vmul.f32 %v247_v51, %v125_v1  ;;  %v178_v39 = vadd.f32 %v177_v38, %v176_v37 }
  0xa0   :  { %v113_v6 = vmul.f32 %v249_v52, %v112_v2 }
  0xa1   :  { %v130_v8 = vsel %vm129_vm7, %v247_v51, %v126_v4  ;;  %v152_v10 = vmul.f32 %v251_v54, %v151_v3  ;;  %v179_v40 = vrot.slane %v178_v39, 1 }
  0xa2   :  { %v117_v9 = vsel %vm116_vm8, %v249_v52, %v113_v6  ;;  %v131_v11 = vmul.f32 %v130_v8, %v97_v5 }
  0xa3   :  { %v118_v12 = vmul.f32 %v117_v9, %v93_v50  ;;  %v156_v19 = vsel %vm155_vm13, %v251_v54, %v152_v10  ;;  %v180_v41 = vadd.f32 %v179_v40, %v178_v39 }
  0xa4   :  { %v231_v15 = vadd.f32 -0.2, %v131_v11  ;;  %v157_v24 = vmul.f32 %v156_v19, %v105_v18 }
  0xa5   :  { %v158_v16 = vsub.f32 2.0, %v118_v12  ;;  %v230_v17 = vadd.f32 -0.2, %v118_v12  ;;  %232 = vpush %v180_v41 }
  0xa6   :  { %v166_v20 = vmax.f32 %v231_v15, 0.0  ;;  %v162_v30 = vsub.f32 %v161_v26, %v157_v24 }
  0xa7   :  { %v164_v21 = vmax.f32 %v230_v17, 0.0  ;;  %v159_v23 = vsub.f32 %v158_v16, %v131_v11 }
  0xa9   :  { %v167_v25 = vadd.f32 %v166_v20, %v164_v21  ;;  %v160_v28 = vmul.f32 %v159_v23, %v426_v27 }
  0xab   :  { %v168_v29 = vmul.f32 %v167_v25, %v69_v31 }
  0xad   :  { %v169_v32 = vadd.f32 %v168_v29, %v160_v28 }
  0xaf   :  { %v170_v33 = vadd.f32 %v169_v32, %v162_v30 }
  0xb1   :  { %v184_v34 = vsel %vm171_vm1, %v170_v33, 0.0 }
  0xb2   :  { %185 = vadd.xlane.f32.xlu0 %v184_v34 }
  0xd6   :  { %s233_s18 = spop %232 }
  0xd7   :  { %v182_v47 = vstv %s233_s18 }
  0xd8   :  { %183 = vst [vmem:[#allocation7] sm:$0xff] %v182_v47 }
  0xd9   :  { %206 = dma.vmem_to_hbm [thread:$0]  %s202_s5, 128, %s204_s17, [#allocation4]  }
 0x125   :  { %v186_v42 = vpop.xlane.xlu0 %185 }
 0x126   :  { %v187_v43 = vrot.slane %v186_v42, 4 }
 0x128   :  { %v188_v44 = vadd.f32 %v187_v43, %v186_v42 }
 0x12a   :  { %v189_v45 = vrot.slane %v188_v44, 2 }
 0x12c   :  { %v190_v27 = vadd.f32 %v189_v45, %v188_v44 }
 0x12e   :  { %v191_v31 = vrot.slane %v190_v27, 1 }
 0x130   :  { %v192_v46 = vadd.f32 %v191_v31, %v190_v27 }
 0x132   :  { %234 = vpush %v192_v46 }
 0x163   :  { %s235_s24 = spop %234 }
 0x164   :  { %v194_v48 = vstv %s235_s24 }
 0x165   :  { %195 = vst [vmem:[#allocation8] sm:$0xff] %v194_v48 }
 0x166   :  { %217 = dma.vmem_to_hbm [thread:$0]  %s213_s20, 128, %s215_s23, [#allocation9]  }
 0x167   :  { %352 = dma.done.wait [#allocation4], 128  }
 0x168   :  { %353 = vsyncadd [#allocation4], 4294967168 }
 0x169   :  { %354 = dma.done.wait [#allocation9], 128  }
 0x16a   :  { %355 = vsyncadd [#allocation9], 4294967168 }
 0x16b   :  { %226 = vsyncpa [#allocation3], 1 }
 0x16c   :  { %227 = vsyncpa [#allocation6], 1 }
 0x16d   :  { %228 = vsyncpa [#allocation4], 1 }
 0x16e   :  { %229 = vsyncpa [#allocation9], 1 }

</bundles_post_ra>
